<compile_context>
chip_gen: v6e
topology: v6e:2x2x1
jax: 0.10.0
libtpu: 0.0.40
codegen_flags: <defaults>
</compile_context>

<pallas_src>
import functools

import jax
import jax.numpy as jnp
from jax.experimental import pallas as pl
from jax.experimental.pallas import tpu as pltpu


def _round_up(n: int, m: int) -> int:
    return ((n + m - 1) // m) * m


def _fused_mlp_kernel(x_ref, w0_ref, b0_ref, wr_ref, br_ref, o_ref, *, n_rest: int):
    """Fused MLP forward for one batch tile.

    x_ref : (TB, IN_pad)  f32
    w0_ref: (IN_pad, H_pad) bf16     first Linear (input_size -> num_neurons)
    b0_ref: (1, H_pad)      f32
    wr_ref: (n_rest, H_pad, H_pad) bf16   remaining Linears (last one = logits)
    br_ref: (n_rest, 1, H_pad)     f32
    o_ref : (TB, H_pad)     f32      padded logits (first 10 cols are real)
    """
    cd = w0_ref.dtype  # compute dtype for MXU inputs (bf16)

    # Layer 0: Linear + ReLU (always followed by ReLU in SimpleNN).
    h = jnp.dot(x_ref[...].astype(cd), w0_ref[...],
                preferred_element_type=jnp.float32)
    h = jnp.maximum(h + b0_ref[...], 0.0)

    # Remaining layers: hidden Linears with ReLU, final Linear without.
    for i in range(n_rest):  # static unrolled loop, i is a Python int
        h = jnp.dot(h.astype(cd), wr_ref[i],
                    preferred_element_type=jnp.float32)
        h = h + br_ref[i]
        if i < n_rest - 1:
            h = jnp.maximum(h, 0.0)

    o_ref[...] = h.astype(o_ref.dtype)


def fused_mlp(x_flat_padded, w0, b0, wr, br, *, real_out: int, tile_b: int = 256):
    """Run the whole MLP in a single pallas_call and slice the real logits."""
    B, IN_pad = x_flat_padded.shape
    H_pad = w0.shape[1]
    n_rest = wr.shape[0]

    tb = min(tile_b, _round_up(B, 8))  # MXU-friendly, multiple of 8
    grid = (pl.cdiv(B, tb),)

    flops = 2 * B * (IN_pad * H_pad + n_rest * H_pad * H_pad)
    bytes_accessed = (
        x_flat_padded.size * x_flat_padded.dtype.itemsize
        + w0.size * w0.dtype.itemsize
        + wr.size * wr.dtype.itemsize
        + b0.size * b0.dtype.itemsize
        + br.size * br.dtype.itemsize
        + B * H_pad * 4
    )

    kernel = functools.partial(_fused_mlp_kernel, n_rest=n_rest)
    out_padded = pl.pallas_call(
        kernel,
        out_shape=jax.ShapeDtypeStruct((B, H_pad), jnp.float32),
        grid_spec=pltpu.PrefetchScalarGridSpec(
            num_scalar_prefetch=0,
            grid=grid,
            in_specs=[
                pl.BlockSpec((tb, IN_pad), lambda i: (i, 0)),          # x batch tile
                pl.BlockSpec((IN_pad, H_pad), lambda i: (0, 0)),       # first weight
                pl.BlockSpec((1, H_pad), lambda i: (0, 0)),            # first bias
                pl.BlockSpec((n_rest, H_pad, H_pad), lambda i: (0, 0, 0)),  # stacked weights
                pl.BlockSpec((n_rest, 1, H_pad), lambda i: (0, 0, 0)),      # stacked biases
            ],
            out_specs=pl.BlockSpec((tb, H_pad), lambda i: (i, 0)),
        ),
        compiler_params=pltpu.CompilerParams(
            dimension_semantics=("parallel",)),
        cost_estimate=pl.CostEstimate(
            flops=int(flops), transcendentals=0,
            bytes_accessed=int(bytes_accessed)),
    )(x_flat_padded, w0, b0, wr, br)

    return out_padded[:, :real_out]


def init_simple_nn_params(key, input_size, num_layers, num_neurons, out_size=10):
    """Deterministic init matching the shapes of SimpleNN.__init__.

    Weights stored as (in, out) = transpose of PyTorch's (out, in).
    """
    params = []
    in_dim = input_size
    dims = [num_neurons] * num_layers + [out_size]
    for out_dim in dims:
        key, kw, kb = jax.random.split(key, 3)
        bound = 1.0 / jnp.sqrt(in_dim)  # same scale as torch.nn.Linear default
        w = jax.random.uniform(kw, (in_dim, out_dim), jnp.float32, -bound, bound)
        b = jax.random.uniform(kb, (out_dim,), jnp.float32, -bound, bound)
        params.append((w, b))
        in_dim = out_dim
    return params


def pack_simple_nn_params(params, input_size, num_neurons, out_size=10,
                          compute_dtype=jnp.bfloat16):
    """Zero-pad all feature dims to multiples of 128 and stack the layers
    after the first one into one (n_rest, H_pad, H_pad) weight tensor."""
    IN_pad = _round_up(input_size, 128)
    H_pad = _round_up(max(num_neurons, out_size), 128)

    w0, b0 = params[0]
    w0_p = jnp.zeros((IN_pad, H_pad), jnp.float32).at[:input_size, :num_neurons].set(w0)
    b0_p = jnp.zeros((1, H_pad), jnp.float32).at[0, :num_neurons].set(b0)

    wr_list, br_list = [], []
    for (w, b) in params[1:]:
        in_d, out_d = w.shape
        wp = jnp.zeros((H_pad, H_pad), jnp.float32).at[:in_d, :out_d].set(w)
        bp = jnp.zeros((1, H_pad), jnp.float32).at[0, :out_d].set(b)
        wr_list.append(wp)
        br_list.append(bp)
    wr = jnp.stack(wr_list).astype(compute_dtype)   # (n_rest, H_pad, H_pad)
    br = jnp.stack(br_list)                          # (n_rest, 1, H_pad) f32

    return dict(w0=w0_p.astype(compute_dtype), b0=b0_p, wr=wr, br=br,
                in_pad=IN_pad, h_pad=H_pad, out_size=out_size)


def simple_nn_forward(x_nchw, packed):
    # nn.Flatten(): keep batch dim, flatten the rest; zero-pad features to IN_pad.
    B = x_nchw.shape[0]
    xf = x_nchw.reshape(B, -1)
    xf = jnp.pad(xf, ((0, 0), (0, packed["in_pad"] - xf.shape[1])))
    return fused_mlp(xf, packed["w0"], packed["b0"], packed["wr"], packed["br"],
                     real_out=packed["out_size"])


if __name__ == "__main__":
    # Small shapes: batch=8, C=2, H=4, W=4 -> input_size = 32
    B, C, H, W = 8, 2, 4, 4
    input_size = C * H * W
    num_layers = 2
    num_neurons = 32

    key = jax.random.PRNGKey(0)
    key, kx = jax.random.split(key)
    x = jax.random.normal(kx, (B, C, H, W), dtype=jnp.float32)

    params = init_simple_nn_params(key, input_size, num_layers, num_neurons)
    packed = pack_simple_nn_params(params, input_size, num_neurons)

    out = simple_nn_forward(x, packed)
    out = jax.block_until_ready(out)

    assert out.shape == (B, 10), out.shape

    # Pure-JAX reference emulating the same bf16-input / f32-accumulate math.
    cd = jnp.bfloat16
    ref = x.reshape(B, -1)
    for i, (w, b) in enumerate(params):
        ref = jnp.dot(ref.astype(cd), w.astype(cd),
                      preferred_element_type=jnp.float32) + b
        if i < len(params) - 1:
            ref = jnp.maximum(ref, 0.0)
    err = float(jnp.max(jnp.abs(out - ref)))
    assert jnp.allclose(out, ref, atol=1e-3, rtol=1e-3), err

    print("KERNEL_OK")
</pallas_src>

<mosaic_0001>
module attributes {stable_mosaic.version = 11 : i64} {
  func.func @_fused_mlp_kernel(%arg0: i32, %arg1: memref<8x128xf32, #tpu.memory_space<vmem>>, %arg2: memref<128x128xbf16, #tpu.memory_space<vmem>>, %arg3: memref<1x128xf32, #tpu.memory_space<vmem>>, %arg4: memref<2x128x128xbf16, #tpu.memory_space<vmem>>, %arg5: memref<2x1x128xf32, #tpu.memory_space<vmem>>, %arg6: memref<8x128xf32, #tpu.memory_space<vmem>>) attributes {dimension_semantics = [#tpu.dimension_semantics<parallel>], iteration_bounds = array<i64: 1>, scalar_prefetch = 0 : i64, scratch_operands = 0 : i64, tpu.core_type = #tpu.core_type<tc>, window_params = [{transform_indices = @transform_0, window_bounds = array<i64: 8, 128>}, {pipeline_mode = #tpu.pipeline_mode<synchronous>, transform_indices = @transform_1, window_bounds = array<i64: 128, 128>}, {pipeline_mode = #tpu.pipeline_mode<synchronous>, transform_indices = @transform_2, window_bounds = array<i64: 1, 128>}, {pipeline_mode = #tpu.pipeline_mode<synchronous>, transform_indices = @transform_3, window_bounds = array<i64: 2, 128, 128>}, {pipeline_mode = #tpu.pipeline_mode<synchronous>, transform_indices = @transform_4, window_bounds = array<i64: 2, 1, 128>}, {transform_indices = @transform_5, window_bounds = array<i64: 8, 128>}]} {
    %c0 = arith.constant 0 : index
    %c0_0 = arith.constant 0 : index
    %0 = vector.load %arg1[%c0, %c0_0] : memref<8x128xf32, #tpu.memory_space<vmem>>, vector<8x128xf32>
    %1 = arith.truncf %0 : vector<8x128xf32> to vector<8x128xbf16>
    %c0_1 = arith.constant 0 : index
    %c0_2 = arith.constant 0 : index
    %2 = vector.load %arg2[%c0_1, %c0_2] : memref<128x128xbf16, #tpu.memory_space<vmem>>, vector<128x128xbf16>
    %cst = arith.constant dense<0.000000e+00> : vector<8x128xf32>
    %3 = tpu.matmul %1, %2, %cst {dimension_numbers = #tpu.dot_dimension_numbers<[1], [0], [0], [1], [0, 0, 1, 1], [], []>} : vector<8x128xbf16>, vector<128x128xbf16>, vector<8x128xf32> -> vector<8x128xf32>
    %c0_3 = arith.constant 0 : index
    %c0_4 = arith.constant 0 : index
    %4 = vector.load %arg3[%c0_3, %c0_4] : memref<1x128xf32, #tpu.memory_space<vmem>>, vector<1x128xf32>
    %5 = vector.broadcast %4 : vector<1x128xf32> to vector<8x128xf32>
    %6 = arith.addf %3, %5 : vector<8x128xf32>
    %cst_5 = arith.constant 0.000000e+00 : f32
    %7 = vector.broadcast %cst_5 : f32 to vector<8x128xf32>
    %8 = arith.maximumf %6, %7 : vector<8x128xf32>
    %9 = arith.truncf %8 : vector<8x128xf32> to vector<8x128xbf16>
    %c0_6 = arith.constant 0 : index
    %c0_7 = arith.constant 0 : index
    %c0_8 = arith.constant 0 : index
    %10 = vector.load %arg4[%c0_6, %c0_7, %c0_8] : memref<2x128x128xbf16, #tpu.memory_space<vmem>>, vector<1x128x128xbf16>
    %11 = vector.shape_cast %10 : vector<1x128x128xbf16> to vector<128x128xbf16>
    %cst_9 = arith.constant dense<0.000000e+00> : vector<8x128xf32>
    %12 = tpu.matmul %9, %11, %cst_9 {dimension_numbers = #tpu.dot_dimension_numbers<[1], [0], [0], [1], [0, 0, 1, 1], [], []>} : vector<8x128xbf16>, vector<128x128xbf16>, vector<8x128xf32> -> vector<8x128xf32>
    %c0_10 = arith.constant 0 : index
    %c0_11 = arith.constant 0 : index
    %c0_12 = arith.constant 0 : index
    %13 = vector.load %arg5[%c0_10, %c0_11, %c0_12] : memref<2x1x128xf32, #tpu.memory_space<vmem>>, vector<1x1x128xf32>
    %14 = vector.shape_cast %13 : vector<1x1x128xf32> to vector<1x128xf32>
    %15 = vector.broadcast %14 : vector<1x128xf32> to vector<8x128xf32>
    %16 = arith.addf %12, %15 : vector<8x128xf32>
    %cst_13 = arith.constant 0.000000e+00 : f32
    %17 = vector.broadcast %cst_13 : f32 to vector<8x128xf32>
    %18 = arith.maximumf %16, %17 : vector<8x128xf32>
    %19 = arith.truncf %18 : vector<8x128xf32> to vector<8x128xbf16>
    %c1 = arith.constant 1 : index
    %c0_14 = arith.constant 0 : index
    %c0_15 = arith.constant 0 : index
    %20 = vector.load %arg4[%c1, %c0_14, %c0_15] : memref<2x128x128xbf16, #tpu.memory_space<vmem>>, vector<1x128x128xbf16>
    %21 = vector.shape_cast %20 : vector<1x128x128xbf16> to vector<128x128xbf16>
    %cst_16 = arith.constant dense<0.000000e+00> : vector<8x128xf32>
    %22 = tpu.matmul %19, %21, %cst_16 {dimension_numbers = #tpu.dot_dimension_numbers<[1], [0], [0], [1], [0, 0, 1, 1], [], []>} : vector<8x128xbf16>, vector<128x128xbf16>, vector<8x128xf32> -> vector<8x128xf32>
    %c1_17 = arith.constant 1 : index
    %c0_18 = arith.constant 0 : index
    %c0_19 = arith.constant 0 : index
    %23 = vector.load %arg5[%c1_17, %c0_18, %c0_19] : memref<2x1x128xf32, #tpu.memory_space<vmem>>, vector<1x1x128xf32>
    %24 = vector.shape_cast %23 : vector<1x1x128xf32> to vector<1x128xf32>
    %25 = vector.broadcast %24 : vector<1x128xf32> to vector<8x128xf32>
    %26 = arith.addf %22, %25 : vector<8x128xf32>
    %c0_20 = arith.constant 0 : index
    %c0_21 = arith.constant 0 : index
    %27 = vector.load %arg6[%c0_20, %c0_21] : memref<8x128xf32, #tpu.memory_space<vmem>>, vector<8x128xf32>
    tpu.vector_store %arg6[%c0_20, %c0_21], %26 {strides = array<i32>} : memref<8x128xf32, #tpu.memory_space<vmem>>, vector<8x128xf32>,
    return
  }
  func.func @transform_0(%arg0: i32) -> (i32, i32) {
    %c0_i32 = arith.constant 0 : i32
    %c0_i32_0 = arith.constant 0 : i32
    return %arg0, %c0_i32 : i32, i32
  }
  func.func @transform_1(%arg0: i32) -> (i32, i32) {
    %c0_i32 = arith.constant 0 : i32
    %c0_i32_0 = arith.constant 0 : i32
    %c0_i32_1 = arith.constant 0 : i32
    return %c0_i32, %c0_i32_0 : i32, i32
  }
  func.func @transform_2(%arg0: i32) -> (i32, i32) {
    %c0_i32 = arith.constant 0 : i32
    %c0_i32_0 = arith.constant 0 : i32
    %c0_i32_1 = arith.constant 0 : i32
    return %c0_i32, %c0_i32_0 : i32, i32
  }
  func.func @transform_3(%arg0: i32) -> (i32, i32, i32) {
    %c0_i32 = arith.constant 0 : i32
    %c0_i32_0 = arith.constant 0 : i32
    %c0_i32_1 = arith.constant 0 : i32
    %c0_i32_2 = arith.constant 0 : i32
    return %c0_i32, %c0_i32_0, %c0_i32_1 : i32, i32, i32
  }
  func.func @transform_4(%arg0: i32) -> (i32, i32, i32) {
    %c0_i32 = arith.constant 0 : i32
    %c0_i32_0 = arith.constant 0 : i32
    %c0_i32_1 = arith.constant 0 : i32
    %c0_i32_2 = arith.constant 0 : i32
    return %c0_i32, %c0_i32_0, %c0_i32_1 : i32, i32, i32
  }
  func.func @transform_5(%arg0: i32) -> (i32, i32) {
    %c0_i32 = arith.constant 0 : i32
    %c0_i32_0 = arith.constant 0 : i32
    return %arg0, %c0_i32 : i32, i32
  }
}

</mosaic_0001>

<bundles_post_ra>
// kernel: tpu_custom_call.1
= control target key start
LH: loop header
LB: loop body
LE: loop exit
PB: predicated region body
PF: predicated region fallthrough
CT: control target
= control target key end

     0   :  { %10 = vsyncpa [#allocation3], 0  ;;  %s741_s0 = inlined_call_operand.hbm [shape: f32[8,128], index: 0, kind: input, shape index: {}]   ;;  %s742_s1 = inlined_call_operand.hbm [shape: bf16[128,128], index: 1, kind: input, shape index: {}]   ;;  %s743_s2 = inlined_call_operand.vmem [shape: f32[1,128], index: 2, kind: input, shape index: {}]   ;;  %s744_s3 = inlined_call_operand.hbm [shape: bf16[2,128,128], index: 3, kind: input, shape index: {}]   ;;  %s745_s4 = inlined_call_operand.vmem [shape: f32[2,1,128], index: 4, kind: input, shape index: {}]   ;;  %s746_s5 = inlined_call_operand.hbm [shape: f32[8,128], index: 5, kind: output, shape index: {}]  }
   0x1   :  { %11 = vsyncpa [#allocation6], 0 }
   0x2   :  { %12 = vsyncpa [#allocation4], 0  ;;  %s652_s18 = smov [#allocation5]  }
   0x3   :  { %s28_s19 = sshll.u32 %s652_s18, 4  ;;  %s29_s19 = int_to_ptr.vmem [resolvable:$true] %s28_s19 }
   0x4   :  { %s574_s20 = scalar_lea.vmem %s29_s19, 1024  ;;  %p579_p1 = scmp.lt.s32.totalorder %s29_s19, %s29_s19 }
   0x5   :  { %p575_p0 = scmp.ne.s32.totalorder %s29_s19, %s574_s20  ;;  %p580_p2 = scmp.lt.s32.totalorder %s574_s20, %s574_s20 }
   0x7   :  { %p581_p3 = por %p580_p2, %p579_p1 }
   0x9   :  { %p582_p4 = pnand %p581_p3, %p575_p0 }
   0xb   :  { %585 = shalt.err (!%p582_p4)
}
   0xc   :  { %s653_s21 = smov 64   ;;  %s654_s22 = smov 4  }
   0xd   :  { %34 = dma.hbm_to_vmem [thread:$0]  %s742_s1, 1024, %s29_s19, [#allocation6], %s653_s21, %s653_s21, %s654_s22  }
   0xe   :  { %s655_s25 = smov [#allocation2]   ;;  %s656_s27 = smov [#allocation7]  }
   0xf   :  { %s19_s26 = sshll.u32 %s655_s25, 4  ;;  %s42_s28 = sshll.u32 %s656_s27, 4  ;;  %s20_s26 = int_to_ptr.vmem [resolvable:$true] %s19_s26  ;;  %s43_s28 = int_to_ptr.vmem [resolvable:$true] %s42_s28 }
  0x10   :  { %s594_s29 = scalar_lea.vmem %s20_s26, 128  ;;  %p599_p6 = scmp.lt.s32.totalorder %s20_s26, %s20_s26 }
  0x11   :  { %p595_p5 = scmp.ne.s32.totalorder %s20_s26, %s594_s29  ;;  %p600_p7 = scmp.lt.s32.totalorder %s594_s29, %s594_s29 }
  0x13   :  { %p601_p8 = por %p600_p7, %p599_p6 }
  0x15   :  { %p602_p9 = pnand %p601_p8, %p595_p5 }
  0x17   :  { %605 = shalt.err (!%p602_p9)
}
  0x18   :  { %22 = dma.hbm_to_vmem [thread:$0]  %s741_s0, 128, %s20_s26, [#allocation3]  }
  0x19   :  { %s614_s7 = scalar_lea.vmem %s43_s28, 2048  ;;  %p619_p11 = scmp.lt.s32.totalorder %s43_s28, %s43_s28 }
  0x1a   :  { %p615_p10 = scmp.ne.s32.totalorder %s43_s28, %s614_s7  ;;  %p620_p12 = scmp.lt.s32.totalorder %s614_s7, %s614_s7 }
  0x1c   :  { %p621_p13 = por %p620_p12, %p619_p11 }
  0x1e   :  { %p622_p0 = pnand %p621_p13, %p615_p10 }
  0x20   :  { %625 = shalt.err (!%p622_p0)
}
  0x21   :  { %48 = dma.hbm_to_vmem [thread:$0]  %s744_s3, 2048, %s43_s28, [#allocation6], %s653_s21, %s653_s21, %s654_s22  }
  0x22   :  { %646 = dma.done.wait [#allocation3], 128  }
  0x23   :  { %647 = vsyncadd [#allocation3], 4294967168 }
  0x24   :  { %648 = dma.done.wait [#allocation6], 3072  }
  0x25   :  { %649 = vsyncadd [#allocation6], 4294964224  ;;  %v657_v0 = vmov 0.0   ;;  %vm658_vm0 = vmmov 0   ;;  %v542_v1 = vld [vmem:[#allocation5 + $0x38] sm:$0xff]   ;;  %v543_v2 = vld [vmem:[#allocation5 + $0x30] sm:$0xff]  }
  0x26   :  { %474 = vmatprep.subr.bf16.mxu0 %v657_v0  ;;  %490 = vmatprep.mubr.msk.bf16.mxu0 %vm658_vm0, %v657_v0  ;;  %v544_v3 = vld [vmem:[#allocation5 + $0x28] sm:$0xff]   ;;  %v550_v4 = vld [vmem:[#allocation7 + $0x38] sm:$0xff]   ;;  %v545_v5 = vld [vmem:[#allocation5 + $0x20] sm:$0xff]   ;;  %s659_s12 = smov [#allocation8]  }
  0x27   :  { %494 = vmatprep.subr.bf16.mxu1 %v657_v0  ;;  %510 = vmatprep.mubr.msk.bf16.mxu1 %vm658_vm0, %v657_v0  ;;  %v551_v6 = vld [vmem:[#allocation7 + $0x30] sm:$0xff]   ;;  %v546_v7 = vld [vmem:[#allocation5 + $0x18] sm:$0xff]   ;;  %v552_v8 = vld [vmem:[#allocation7 + $0x28] sm:$0xff]   ;;  %s409_s13 = sshll.u32 %s659_s12, 4  ;;  %s410_s13 = int_to_ptr.vmem [resolvable:$true] %s409_s13 }
  0x28   :  { %475 = vmatpush3.bf16.msra.mxu0 %v542_v1  ;;  %495 = vmatpush3.bf16.msra.mxu1 %v550_v4  ;;  %v547_v9 = vld [vmem:[#allocation5 + $0x10] sm:$0xff]   ;;  %v553_v10 = vld [vmem:[#allocation7 + $0x20] sm:$0xff]   ;;  %v548_v11 = vld [vmem:[#allocation5 + $0x8] sm:$0xff]   ;;  %s626_s14 = scalar_lea.vmem %s410_s13, 128  ;;  %p631_p2 = scmp.lt.s32.totalorder %s410_s13, %s410_s13 }
  0x29   :  { %476 = vmatprep.subr.bf16.mxu0 %v657_v0  ;;  %496 = vmatprep.subr.bf16.mxu1 %v657_v0  ;;  %v554_v12 = vld [vmem:[#allocation7 + $0x18] sm:$0xff]   ;;  %v549_v13 = vld [vmem:[#allocation5] sm:$0xff]   ;;  %v555_v15 = vld [vmem:[#allocation7 + $0x10] sm:$0xff]   ;;  %p627_p1 = scmp.ne.s32.totalorder %s410_s13, %s626_s14  ;;  %p632_p3 = scmp.lt.s32.totalorder %s626_s14, %s626_s14 }
  0x2a   :  { %v61_v14 = vld [vmem:[#allocation2] sm:$0xff]  ;;  %v556_v17 = vld [vmem:[#allocation7 + $0x8] sm:$0xff]   ;;  %v557_v18 = vld [vmem:[#allocation7] sm:$0xff]  }
  0x2b   :  { %v62_v16 = vpack.c.bf16 %v61_v14, %v61_v14  ;;  %v558_v19 = vld [vmem:[#allocation7 + $0x78] sm:$0xff]   ;;  %v559_v20 = vld [vmem:[#allocation7 + $0x70] sm:$0xff]   ;;  %v560_v21 = vld [vmem:[#allocation7 + $0x68] sm:$0xff]   ;;  %p633_p4 = por %p632_p3, %p631_p2 }
  0x2c   :  { %477 = vmatpush3.bf16.msra.mxu0 %v543_v2  ;;  %497 = vmatpush3.bf16.msra.mxu1 %v551_v6  ;;  %v561_v22 = vld [vmem:[#allocation7 + $0x60] sm:$0xff]   ;;  %v562_v23 = vld [vmem:[#allocation7 + $0x58] sm:$0xff]   ;;  %v563_v24 = vld [vmem:[#allocation7 + $0x50] sm:$0xff]  }
  0x2d   :  { %478 = vmatprep.subr.bf16.mxu0 %v657_v0  ;;  %498 = vmatprep.subr.bf16.mxu1 %v657_v0  ;;  %v419_v25 = vld [vmem:[%s743_s2] ss:$0 sm:$0xff]  ;;  %v564_v33 = vld [vmem:[#allocation7 + $0x48] sm:$0xff]   ;;  %v565_v34 = vld [vmem:[#allocation7 + $0x40] sm:$0xff]   ;;  %p634_p5 = pnand %p633_p4, %p627_p1 }
  0x2e   :  { %v428_v35 = vld [vmem:[%s745_s4] ss:$0 sm:$0xff]  ;;  %v438_v43 = vld [vmem:[%s745_s4 + $0x1] ss:$0 sm:$0xff] }
  0x30   :  { %479 = vmatpush3.bf16.msra.mxu0 %v544_v3  ;;  %499 = vmatpush3.bf16.msra.mxu1 %v552_v8 }
  0x31   :  { %480 = vmatprep.subr.bf16.mxu0 %v657_v0  ;;  %500 = vmatprep.subr.bf16.mxu1 %v657_v0 }
  0x34   :  { %481 = vmatpush3.bf16.msra.mxu0 %v545_v5  ;;  %501 = vmatpush3.bf16.msra.mxu1 %v553_v10 }
  0x35   :  { %482 = vmatprep.subr.bf16.mxu0 %v657_v0  ;;  %502 = vmatprep.subr.bf16.mxu1 %v657_v0 }
  0x38   :  { %483 = vmatpush3.bf16.msra.mxu0 %v546_v7  ;;  %503 = vmatpush3.bf16.msra.mxu1 %v554_v12 }
  0x39   :  { %484 = vmatprep.subr.bf16.mxu0 %v657_v0  ;;  %504 = vmatprep.subr.bf16.mxu1 %v657_v0 }
  0x3c   :  { %485 = vmatpush3.bf16.msra.mxu0 %v547_v9  ;;  %505 = vmatpush3.bf16.msra.mxu1 %v555_v15 }
  0x3d   :  { %486 = vmatprep.subr.bf16.mxu0 %v657_v0  ;;  %506 = vmatprep.subr.bf16.mxu1 %v657_v0 }
  0x40   :  { %487 = vmatpush3.bf16.msra.mxu0 %v548_v11  ;;  %507 = vmatpush3.bf16.msra.mxu1 %v556_v17 }
  0x41   :  { %488 = vmatprep.subr.bf16.mxu0 %v657_v0  ;;  %508 = vmatprep.subr.bf16.mxu1 %v657_v0 }
  0x44   :  { %489 = vmatpush3.bf16.msra.mxu0 %v549_v13  ;;  %509 = vmatpush3.bf16.msra.mxu1 %v557_v18 }
  0x45   :  { %514 = vmatprep.subr.bf16.mxu0 %v657_v0 }
  0x47   :  { %491 = vmatmul.mubr.bf16.vlgmr.msra.gmra.mxu0 %v62_v16 }
  0x48   :  { %530 = vmatprep.mubr.msk.bf16.mxu0 %vm658_vm0, %v657_v0  ;;  %515 = vmatpush3.bf16.msra.mxu0 %v558_v19 }
  0x49   :  { %516 = vmatprep.subr.bf16.mxu0 %v657_v0 }
  0x4c   :  { %517 = vmatpush3.bf16.msra.mxu0 %v559_v20 }
  0x4d   :  { %518 = vmatprep.subr.bf16.mxu0 %v657_v0 }
  0x50   :  { %519 = vmatpush3.bf16.msra.mxu0 %v560_v21 }
  0x51   :  { %520 = vmatprep.subr.bf16.mxu0 %v657_v0 }
  0x54   :  { %521 = vmatpush3.bf16.msra.mxu0 %v561_v22 }
  0x55   :  { %522 = vmatprep.subr.bf16.mxu0 %v657_v0 }
  0x58   :  { %523 = vmatpush3.bf16.msra.mxu0 %v562_v23 }
  0x59   :  { %524 = vmatprep.subr.bf16.mxu0 %v657_v0 }
  0x5c   :  { %525 = vmatpush3.bf16.msra.mxu0 %v563_v24 }
  0x5d   :  { %526 = vmatprep.subr.bf16.mxu0 %v657_v0 }
  0x60   :  { %527 = vmatpush3.bf16.msra.mxu0 %v564_v33 }
  0x61   :  { %528 = vmatprep.subr.bf16.mxu0 %v657_v0 }
  0x64   :  { %529 = vmatpush3.bf16.msra.mxu0 %v565_v34 }
 0x107   :  { %v168_v26 = vpop.f32.mrf.mxu0 }
 0x108   :  { %v169_v27 = vadd.f32 %v419_v25, %v168_v26 }
 0x109   :  { %v492_v28 = vpop.f32.mrf.mxu0 }
 0x10a   :  { %v174_v29 = vmax.f32 %v169_v27, 0.0 }
 0x10b   :  { %v171_v30 = vpop.f32.mrf.mxu0 }
 0x10c   :  { %v175_v31 = vpack.c.bf16 %v174_v29, %v174_v29 }
 0x10d   :  { %v493_v32 = vpop.f32.mrf.mxu0 }
 0x10e   :  { %511 = vmatmul.mubr.bf16.vlgmr.msra.gmra.mxu1 %v175_v31 }
 0x1ce   :  { %v281_v36 = vpop.f32.mrf.mxu1 }
 0x1cf   :  { %v282_v37 = vadd.f32 %v428_v35, %v281_v36 }
 0x1d0   :  { %v512_v38 = vpop.f32.mrf.mxu1 }
 0x1d1   :  { %v287_v39 = vmax.f32 %v282_v37, 0.0 }
 0x1d2   :  { %v284_v40 = vpop.f32.mrf.mxu1 }
 0x1d3   :  { %v288_v41 = vpack.c.bf16 %v287_v39, %v287_v39 }
 0x1d4   :  { %v513_v42 = vpop.f32.mrf.mxu1 }
 0x1d5   :  { %531 = vmatmul.mubr.bf16.vlgmr.msra.gmra.mxu0 %v288_v41 }
 0x295   :  { %v396_v44 = vpop.f32.mrf.mxu0 }
 0x296   :  { %v397_v45 = vadd.f32 %v438_v43, %v396_v44 }
 0x297   :  { %v532_v46 = vpop.f32.mrf.mxu0 }
 0x298   :  { %402 = vst [vmem:[#allocation8] sm:$0xff] %v397_v45 }
 0x299   :  { %v399_v47 = vpop.f32.mrf.mxu0 }
 0x29a   :  { %637 = shalt.err (!%p634_p5)
}
 0x29b   :  { %412 = dma.vmem_to_hbm [thread:$0]  %s410_s13, 128, %s746_s5, [#allocation4]   ;;  %v533_v48 = vpop.f32.mrf.mxu0 }
 0x29c   :  { %650 = dma.done.wait [#allocation4], 128  }
 0x29d   :  { %651 = vsyncadd [#allocation4], 4294967168 }
 0x29e   :  { %416 = vsyncpa [#allocation3], 1 }
 0x29f   :  { %417 = vsyncpa [#allocation6], 1 }
 0x2a0   :  { %418 = vsyncpa [#allocation4], 1 }

</bundles_post_ra>
